<compile_context>
chip_gen: v7x
topology: tpu7x:2x2x1
jax: 0.10.0
libtpu: 0.0.40
codegen_flags: <defaults>
</compile_context>

<pallas_src>
import functools

import jax
import jax.numpy as jnp
from jax.experimental import pallas as pl
from jax.experimental.pallas import tpu as pltpu


def _mha_kernel(q_ref, k_ref, wq_ref, wkv_ref, o_ref, *, num_heads, t_q, t_k):
    # q_ref : [B*T_q, Dq]   (batch folded into rows)
    # k_ref : [B*T_k, Dk]
    # wq_ref: [Dq, U]       (1/sqrt(key_dim) already folded in)
    # wkv_ref: [Dk, 2U]     (K columns first, V columns second)
    # o_ref : [B*T_q, U]
    bt_q = q_ref.shape[0]
    U = wq_ref.shape[1]
    H = num_heads
    d = U // H
    B = bt_q // t_q
    compute_dtype = q_ref.dtype                 # bf16 stays bf16 on the MXU

    # ---- Fused projections (K|V in one matmul); accumulate in f32 -----------
    Q = jnp.dot(q_ref[...], wq_ref[...],
                preferred_element_type=jnp.float32)          # [B*T_q, U]
    KV = jnp.dot(k_ref[...], wkv_ref[...],
                 preferred_element_type=jnp.float32)         # [B*T_k, 2U]
    Qc = Q.astype(compute_dtype)
    KVc = KV.astype(compute_dtype)

    # ---- Head split: H static lane slices + free leading splits + one axis-0
    #      concat per operand.  Batched layout g = h*B + b. ---------------------
    Qh = jnp.concatenate(
        [Qc[:, h * d:(h + 1) * d].reshape(B, t_q, d) for h in range(H)],
        axis=0)                                              # [H*B, T_q, d]
    Kh = jnp.concatenate(
        [KVc[:, h * d:(h + 1) * d].reshape(B, t_k, d) for h in range(H)],
        axis=0)                                              # [H*B, T_k, d]
    Vh = jnp.concatenate(
        [KVc[:, U + h * d:U + (h + 1) * d].reshape(B, t_k, d) for h in range(H)],
        axis=0)                                              # [H*B, T_k, d]

    # ---- Single g-batched attention; softmax math stays in f32 ---------------
    s = jnp.einsum('gqd,gkd->gqk', Qh, Kh,
                   preferred_element_type=jnp.float32)       # [H*B, T_q, T_k]
    s = s - jnp.max(s, axis=-1, keepdims=True)               # stable softmax
    p = jnp.exp(s)
    denom = jnp.sum(p, axis=-1, keepdims=True)               # [H*B, T_q, 1] f32
    o = jnp.einsum('gqk,gkd->gqd', p.astype(compute_dtype), Vh,
                   preferred_element_type=jnp.float32)       # [H*B, T_q, d]
    # Deferred normalization on the [T_q, d] output; EUP approximate reciprocal
    # keeps this off the VALU slots.
    o = o * pl.reciprocal(denom, approx=True)

    # ---- Head merge: free leading-dim slices/merges + one lane concat;
    #      single sublane-dense store. ------------------------------------------
    out = jnp.concatenate(
        [o[h * B:(h + 1) * B].reshape(bt_q, d) for h in range(H)],
        axis=-1)                                             # [B*T_q, U]
    o_ref[...] = out.astype(o_ref.dtype)


def prepare_weights(w_query, w_key, w_value, key_dim):
    """One-time weight prep (call OUTSIDE the hot path).

    - nn.Linear layout [out_features, in_features] -> [in, out],
    - K|V fused into one matrix,
    - the 1/sqrt(key_dim) attention scale folded into W_query (bias-free linear
      => mathematically identical; removes a full-tile VPU multiply per step).
    """
    scale = 1.0 / (float(key_dim) ** 0.5)
    wq_t = jnp.asarray(w_query).T * scale                        # [Dq, U]
    wkv_t = jnp.concatenate([jnp.asarray(w_key).T,
                             jnp.asarray(w_value).T], axis=1)    # [Dk, 2U]
    return wq_t, wkv_t


def _pick_batch_block(N, T_q, T_k, Dq, Dk, U, num_heads, itemsize,
                      budget_bytes=24 * 1024 * 1024):
    """Largest legal batch block that fits a conservative VMEM budget.

    Prefers >= 2 grid steps so the 'parallel' batch axis can shard across the
    two TensorCores of a v7x chip (harmless ~0.35us extra on v5e/v6e).
    The budget leaves slack under v7x's 64 MiB physical VMEM (128 MiB v5e/v6e).
    """
    sub = 8 if itemsize >= 4 else (16 if itemsize == 2 else 32)

    def footprint(B):
        tiles = 2 * itemsize * B * (T_q * Dq + T_k * Dk + T_q * U)   # dbl-buffered I/O
        weights = 2 * itemsize * (Dq * U + 2 * Dk * U)
        inter = 4 * B * (5 * T_q * U + 5 * T_k * U
                         + 2 * num_heads * T_q * T_k + T_q * Dq + T_k * Dk)
        return tiles + weights + 2 * inter                           # 2x margin on temps

    def legal(B):
        if N % B:
            return False
        q_ok = (B * T_q) % sub == 0 or B == N     # second-minor block dim rule
        k_ok = (B * T_k) % sub == 0 or B == N
        return q_ok and k_ok and footprint(B) <= budget_bytes

    candidates = [b for b in range(1, N + 1) if legal(b)]
    if not candidates:
        return N
    multi = [b for b in candidates if N // b >= 2]
    return max(multi) if multi else max(candidates)


def multi_head_attention(query, key, wq_t, wkv_t, *, num_heads, batch_block=None):
    """query: [N, T_q, Dq]; key: [N, T_k, Dk];
    wq_t: [Dq, U] (scale folded); wkv_t: [Dk, 2U]  (from prepare_weights).
    Returns [N, T_q, U]."""
    N, T_q, Dq = query.shape
    Nk, T_k, Dk = key.shape
    assert N == Nk
    U = wq_t.shape[1]
    assert wq_t.shape == (Dq, U)
    assert wkv_t.shape == (Dk, 2 * U)
    assert U % num_heads == 0

    itemsize = jnp.dtype(query.dtype).itemsize
    if batch_block is None:
        batch_block = _pick_batch_block(N, T_q, T_k, Dq, Dk, U, num_heads, itemsize)
    B = batch_block
    assert N % B == 0

    # Fold the batch into the row (sublane) axis: free, contiguous reshapes in
    # the wrapper; the kernel sees plain 2-D slabs and every block has a
    # multiple-of-8 second-minor dim.
    q2 = query.reshape(N * T_q, Dq)
    k2 = key.reshape(N * T_k, Dk)

    kernel = functools.partial(_mha_kernel, num_heads=num_heads, t_q=T_q, t_k=T_k)

    out2 = pl.pallas_call(
        kernel,
        out_shape=jax.ShapeDtypeStruct((N * T_q, U), query.dtype),
        grid_spec=pltpu.PrefetchScalarGridSpec(
            num_scalar_prefetch=0,
            grid=(N // B,),
            in_specs=[
                pl.BlockSpec((B * T_q, Dq), lambda i: (i, 0)),
                pl.BlockSpec((B * T_k, Dk), lambda i: (i, 0)),
                pl.BlockSpec((Dq, U), lambda i: (0, 0)),
                pl.BlockSpec((Dk, 2 * U), lambda i: (0, 0)),
            ],
            out_specs=pl.BlockSpec((B * T_q, U), lambda i: (i, 0)),
        ),
        compiler_params=pltpu.CompilerParams(
            dimension_semantics=("parallel",),
            # Well under v7x's 64 MiB physical VMEM; plenty on v5e/v6e.
            vmem_limit_bytes=48 * 1024 * 1024,
        ),
    )(q2, k2, wq_t, wkv_t)
    return out2.reshape(N, T_q, U)


def _reference(query, key, w_query, w_key, w_value, *, num_heads, key_dim):
    # Pure-JAX reference mirroring the PyTorch forward exactly.
    Q = query @ w_query.T                                             # [N, T_q, U]
    K = key @ w_key.T                                                 # [N, T_k, U]
    V = key @ w_value.T                                               # [N, T_k, U]
    U = Q.shape[-1]
    d = U // num_heads
    Qh = jnp.stack(jnp.split(Q, U // d, axis=2), axis=0)              # [h, N, T_q, d]
    Kh = jnp.stack(jnp.split(K, U // d, axis=2), axis=0)
    Vh = jnp.stack(jnp.split(V, U // d, axis=2), axis=0)
    s = jnp.einsum('hnqd,hnkd->hnqk', Qh, Kh) / (float(key_dim) ** 0.5)
    p = jax.nn.softmax(s, axis=3)
    o = jnp.einsum('hnqk,hnkd->hnqd', p, Vh)                          # [h, N, T_q, d]
    return jnp.concatenate(jnp.split(o, num_heads, axis=0), axis=3)[0]


if __name__ == "__main__":
    # Small shapes consistent with the module.
    N, T_q, T_k = 2, 8, 8
    query_dim, key_dim, num_units, num_heads = 32, 32, 32, 4

    root = jax.random.PRNGKey(0)
    kq, kk, k1, k2, k3 = jax.random.split(root, 5)

    query = jax.random.normal(kq, (N, T_q, query_dim), dtype=jnp.float32)
    key = jax.random.normal(kk, (N, T_k, key_dim), dtype=jnp.float32)

    # Deterministic nn.Linear-style weights: [out_features, in_features].
    w_query = jax.random.normal(k1, (num_units, query_dim), dtype=jnp.float32) * 0.1
    w_key = jax.random.normal(k2, (num_units, key_dim), dtype=jnp.float32) * 0.1
    w_value = jax.random.normal(k3, (num_units, key_dim), dtype=jnp.float32) * 0.1

    # One-time weight prep (outside the hot path).
    wq_t, wkv_t = prepare_weights(w_query, w_key, w_value, key_dim)
    wq_t, wkv_t = jax.block_until_ready((wq_t, wkv_t))

    out = multi_head_attention(query, key, wq_t, wkv_t, num_heads=num_heads)
    out = jax.block_until_ready(out)

    ref = _reference(query, key, w_query, w_key, w_value,
                     num_heads=num_heads, key_dim=key_dim)
    assert out.shape == (N, T_q, num_units)
    # Tolerance relaxed to 2e-3 because the softmax denominator uses the EUP
    # approximate reciprocal (pl.reciprocal(approx=True)); everything else is f32.
    assert jnp.allclose(out, ref, atol=2e-3, rtol=2e-3), "mismatch vs reference"

    print("KERNEL_OK")
</pallas_src>

<mosaic_0001>
module attributes {stable_mosaic.version = 11 : i64} {
  func.func @_mha_kernel(%arg0: i32, %arg1: memref<8x32xf32, #tpu.memory_space<vmem>>, %arg2: memref<8x32xf32, #tpu.memory_space<vmem>>, %arg3: memref<32x32xf32, #tpu.memory_space<vmem>>, %arg4: memref<32x64xf32, #tpu.memory_space<vmem>>, %arg5: memref<8x32xf32, #tpu.memory_space<vmem>>) attributes {dimension_semantics = [#tpu.dimension_semantics<parallel>], iteration_bounds = array<i64: 2>, scalar_prefetch = 0 : i64, scratch_operands = 0 : i64, tpu.core_type = #tpu.core_type<tc>, window_params = [{transform_indices = @transform_0, window_bounds = array<i64: 8, 32>}, {transform_indices = @transform_1, window_bounds = array<i64: 8, 32>}, {pipeline_mode = #tpu.pipeline_mode<synchronous>, transform_indices = @transform_2, window_bounds = array<i64: 32, 32>}, {pipeline_mode = #tpu.pipeline_mode<synchronous>, transform_indices = @transform_3, window_bounds = array<i64: 32, 64>}, {transform_indices = @transform_4, window_bounds = array<i64: 8, 32>}]} {
    %c0 = arith.constant 0 : index
    %c0_0 = arith.constant 0 : index
    %0 = vector.load %arg1[%c0, %c0_0] : memref<8x32xf32, #tpu.memory_space<vmem>>, vector<8x32xf32>
    %c0_1 = arith.constant 0 : index
    %c0_2 = arith.constant 0 : index
    %1 = vector.load %arg3[%c0_1, %c0_2] : memref<32x32xf32, #tpu.memory_space<vmem>>, vector<32x32xf32>
    %cst = arith.constant dense<0.000000e+00> : vector<8x32xf32>
    %2 = tpu.matmul %0, %1, %cst {dimension_numbers = #tpu.dot_dimension_numbers<[1], [0], [0], [1], [0, 0, 1, 1], [], []>} : vector<8x32xf32>, vector<32x32xf32>, vector<8x32xf32> -> vector<8x32xf32>
    %c0_3 = arith.constant 0 : index
    %c0_4 = arith.constant 0 : index
    %3 = vector.load %arg2[%c0_3, %c0_4] : memref<8x32xf32, #tpu.memory_space<vmem>>, vector<8x32xf32>
    %c0_5 = arith.constant 0 : index
    %c0_6 = arith.constant 0 : index
    %4 = vector.load %arg4[%c0_5, %c0_6] : memref<32x64xf32, #tpu.memory_space<vmem>>, vector<32x64xf32>
    %cst_7 = arith.constant dense<0.000000e+00> : vector<8x64xf32>
    %5 = tpu.matmul %3, %4, %cst_7 {dimension_numbers = #tpu.dot_dimension_numbers<[1], [0], [0], [1], [0, 0, 1, 1], [], []>} : vector<8x32xf32>, vector<32x64xf32>, vector<8x64xf32> -> vector<8x64xf32>
    %6 = vector.extract_strided_slice %2 {offsets = [0, 0], sizes = [8, 8], strides = [1, 1]} : vector<8x32xf32> to vector<8x8xf32>
    %7 = vector.shape_cast %6 : vector<8x8xf32> to vector<1x8x8xf32>
    %8 = vector.extract_strided_slice %2 {offsets = [0, 8], sizes = [8, 8], strides = [1, 1]} : vector<8x32xf32> to vector<8x8xf32>
    %9 = vector.shape_cast %8 : vector<8x8xf32> to vector<1x8x8xf32>
    %10 = vector.extract_strided_slice %2 {offsets = [0, 16], sizes = [8, 8], strides = [1, 1]} : vector<8x32xf32> to vector<8x8xf32>
    %11 = vector.shape_cast %10 : vector<8x8xf32> to vector<1x8x8xf32>
    %12 = vector.extract_strided_slice %2 {offsets = [0, 24], sizes = [8, 8], strides = [1, 1]} : vector<8x32xf32> to vector<8x8xf32>
    %13 = vector.shape_cast %12 : vector<8x8xf32> to vector<1x8x8xf32>
    %14 = tpu.concatenate %7, %9, %11, %13 in 0 : vector<1x8x8xf32>, vector<1x8x8xf32>, vector<1x8x8xf32>, vector<1x8x8xf32> -> vector<4x8x8xf32>
    %15 = vector.extract_strided_slice %5 {offsets = [0, 0], sizes = [8, 8], strides = [1, 1]} : vector<8x64xf32> to vector<8x8xf32>
    %16 = vector.shape_cast %15 : vector<8x8xf32> to vector<1x8x8xf32>
    %17 = vector.extract_strided_slice %5 {offsets = [0, 8], sizes = [8, 8], strides = [1, 1]} : vector<8x64xf32> to vector<8x8xf32>
    %18 = vector.shape_cast %17 : vector<8x8xf32> to vector<1x8x8xf32>
    %19 = vector.extract_strided_slice %5 {offsets = [0, 16], sizes = [8, 8], strides = [1, 1]} : vector<8x64xf32> to vector<8x8xf32>
    %20 = vector.shape_cast %19 : vector<8x8xf32> to vector<1x8x8xf32>
    %21 = vector.extract_strided_slice %5 {offsets = [0, 24], sizes = [8, 8], strides = [1, 1]} : vector<8x64xf32> to vector<8x8xf32>
    %22 = vector.shape_cast %21 : vector<8x8xf32> to vector<1x8x8xf32>
    %23 = tpu.concatenate %16, %18, %20, %22 in 0 : vector<1x8x8xf32>, vector<1x8x8xf32>, vector<1x8x8xf32>, vector<1x8x8xf32> -> vector<4x8x8xf32>
    %24 = vector.extract_strided_slice %5 {offsets = [0, 32], sizes = [8, 8], strides = [1, 1]} : vector<8x64xf32> to vector<8x8xf32>
    %25 = vector.shape_cast %24 : vector<8x8xf32> to vector<1x8x8xf32>
    %26 = vector.extract_strided_slice %5 {offsets = [0, 40], sizes = [8, 8], strides = [1, 1]} : vector<8x64xf32> to vector<8x8xf32>
    %27 = vector.shape_cast %26 : vector<8x8xf32> to vector<1x8x8xf32>
    %28 = vector.extract_strided_slice %5 {offsets = [0, 48], sizes = [8, 8], strides = [1, 1]} : vector<8x64xf32> to vector<8x8xf32>
    %29 = vector.shape_cast %28 : vector<8x8xf32> to vector<1x8x8xf32>
    %30 = vector.extract_strided_slice %5 {offsets = [0, 56], sizes = [8, 8], strides = [1, 1]} : vector<8x64xf32> to vector<8x8xf32>
    %31 = vector.shape_cast %30 : vector<8x8xf32> to vector<1x8x8xf32>
    %32 = tpu.concatenate %25, %27, %29, %31 in 0 : vector<1x8x8xf32>, vector<1x8x8xf32>, vector<1x8x8xf32>, vector<1x8x8xf32> -> vector<4x8x8xf32>
    "tpu.trace_start"() <{level = 10 : i32, message = "gqd,gkd->gqk"}> : () -> ()
    %cst_8 = arith.constant dense<0.000000e+00> : vector<4x8x8xf32>
    %33 = tpu.matmul %14, %23, %cst_8 {dimension_numbers = #tpu.dot_dimension_numbers<[2], [2], [1], [1], [0, 0, 0, 1, 1, 1], [0], [0]>} : vector<4x8x8xf32>, vector<4x8x8xf32>, vector<4x8x8xf32> -> vector<4x8x8xf32>
    "tpu.trace_stop"() : () -> ()
    %cst_9 = arith.constant dense<0xFF800000> : vector<4x8xf32>
    %34 = vector.multi_reduction <maximumf>, %33, %cst_9 [2] : vector<4x8x8xf32> to vector<4x8xf32>
    %35 = vector.shape_cast %34 : vector<4x8xf32> to vector<4x8x1xf32>
    %36 = vector.broadcast %35 : vector<4x8x1xf32> to vector<4x8x8xf32>
    %37 = arith.subf %33, %36 : vector<4x8x8xf32>
    %38 = math.exp %37 : vector<4x8x8xf32>
    %cst_10 = arith.constant dense<0.000000e+00> : vector<4x8xf32>
    %39 = vector.multi_reduction <add>, %38, %cst_10 [2] : vector<4x8x8xf32> to vector<4x8xf32>
    %40 = vector.shape_cast %39 : vector<4x8xf32> to vector<4x8x1xf32>
    "tpu.trace_start"() <{level = 10 : i32, message = "gqk,gkd->gqd"}> : () -> ()
    %cst_11 = arith.constant dense<0.000000e+00> : vector<4x8x8xf32>
    %41 = tpu.matmul %38, %32, %cst_11 {dimension_numbers = #tpu.dot_dimension_numbers<[2], [1], [1], [2], [0, 0, 0, 1, 1, 2], [0], [0]>} : vector<4x8x8xf32>, vector<4x8x8xf32>, vector<4x8x8xf32> -> vector<4x8x8xf32>
    "tpu.trace_stop"() : () -> ()
    %42 = tpu.reciprocal %40 {approx = true} : vector<4x8x1xf32> -> vector<4x8x1xf32>
    %43 = vector.broadcast %42 : vector<4x8x1xf32> to vector<4x8x8xf32>
    %44 = arith.mulf %41, %43 : vector<4x8x8xf32>
    %45 = vector.extract_strided_slice %44 {offsets = [0, 0, 0], sizes = [1, 8, 8], strides = [1, 1, 1]} : vector<4x8x8xf32> to vector<1x8x8xf32>
    %46 = vector.shape_cast %45 : vector<1x8x8xf32> to vector<8x8xf32>
    %47 = vector.extract_strided_slice %44 {offsets = [1, 0, 0], sizes = [1, 8, 8], strides = [1, 1, 1]} : vector<4x8x8xf32> to vector<1x8x8xf32>
    %48 = vector.shape_cast %47 : vector<1x8x8xf32> to vector<8x8xf32>
    %49 = vector.extract_strided_slice %44 {offsets = [2, 0, 0], sizes = [1, 8, 8], strides = [1, 1, 1]} : vector<4x8x8xf32> to vector<1x8x8xf32>
    %50 = vector.shape_cast %49 : vector<1x8x8xf32> to vector<8x8xf32>
    %51 = vector.extract_strided_slice %44 {offsets = [3, 0, 0], sizes = [1, 8, 8], strides = [1, 1, 1]} : vector<4x8x8xf32> to vector<1x8x8xf32>
    %52 = vector.shape_cast %51 : vector<1x8x8xf32> to vector<8x8xf32>
    %53 = tpu.concatenate %46, %48, %50, %52 in 1 : vector<8x8xf32>, vector<8x8xf32>, vector<8x8xf32>, vector<8x8xf32> -> vector<8x32xf32>
    %c0_12 = arith.constant 0 : index
    %c0_13 = arith.constant 0 : index
    %54 = vector.load %arg5[%c0_12, %c0_13] : memref<8x32xf32, #tpu.memory_space<vmem>>, vector<8x32xf32>
    tpu.vector_store %arg5[%c0_12, %c0_13], %53 {strides = array<i32>} : memref<8x32xf32, #tpu.memory_space<vmem>>, vector<8x32xf32>,
    return
  }
  func.func @transform_0(%arg0: i32) -> (i32, i32) {
    %c0_i32 = arith.constant 0 : i32
    %c0_i32_0 = arith.constant 0 : i32
    return %arg0, %c0_i32 : i32, i32
  }
  func.func @transform_1(%arg0: i32) -> (i32, i32) {
    %c0_i32 = arith.constant 0 : i32
    %c0_i32_0 = arith.constant 0 : i32
    return %arg0, %c0_i32 : i32, i32
  }
  func.func @transform_2(%arg0: i32) -> (i32, i32) {
    %c0_i32 = arith.constant 0 : i32
    %c0_i32_0 = arith.constant 0 : i32
    %c0_i32_1 = arith.constant 0 : i32
    return %c0_i32, %c0_i32_0 : i32, i32
  }
  func.func @transform_3(%arg0: i32) -> (i32, i32) {
    %c0_i32 = arith.constant 0 : i32
    %c0_i32_0 = arith.constant 0 : i32
    %c0_i32_1 = arith.constant 0 : i32
    return %c0_i32, %c0_i32_0 : i32, i32
  }
  func.func @transform_4(%arg0: i32) -> (i32, i32) {
    %c0_i32 = arith.constant 0 : i32
    %c0_i32_0 = arith.constant 0 : i32
    return %arg0, %c0_i32 : i32, i32
  }
}

</mosaic_0001>

<bundles_post_ra>
// kernel: tpu_custom_call.1
= control target key start
LH: loop header
LB: loop body
LE: loop exit
PB: predicated region body
PF: predicated region fallthrough
CT: control target
= control target key end

     0   :  { %s2044_s0 = inlined_call_operand.hbm [shape: f32[16,32], index: 0, kind: input, shape index: {}]   ;;  %s2045_s1 = inlined_call_operand.hbm [shape: f32[16,32], index: 1, kind: input, shape index: {}]   ;;  %s2046_s2 = inlined_call_operand.hbm [shape: f32[32,32], index: 2, kind: input, shape index: {}]   ;;  %s2047_s3 = inlined_call_operand.hbm [shape: f32[32,64], index: 3, kind: input, shape index: {}]   ;;  %s2048_s4 = inlined_call_operand.hbm [shape: f32[16,32], index: 4, kind: output, shape index: {}]  }
   0x1   :  { %2053 = sst [smem:[#allocation16_spill]] %s2046_s2 }
   0x2   :  { %9 = vsyncpa [#allocation3], 0 }
   0x3   :  { %11 = vsyncpa [#allocation3 + $0x1], 0 }
   0x4   :  { %12 = vsyncpa [#allocation6], 0 }
   0x5   :  { %14 = vsyncpa [#allocation6 + $0x1], 0 }
   0x6   :  { %15 = vsyncpa [#allocation9], 0 }
   0x7   :  { %16 = vsyncpa [#allocation4], 0 }
   0x8   :  { %18 = vsyncpa [#allocation4 + $0x1], 0  ;;  %s1710_s15 = smov 0   ;;  %s1712_s16 = smov 0  }
   0x9   :  { %s1714_s17 = smov 0   ;;  %s1716_s18 = smov 0  }
   0xa LB: > { %s1731_s19 = sadd.s32 4294967295, %s1666_s18   ;;  %s1239_s20 = sadd.s32 4294967294, %s1666_s18   ;;  %s1666_s18 = sphi %s1716_s18, %s2074_s18   ;;  %s1662_s17 = sphi %s1714_s17, %s2073_s17   ;;  %s1658_s16 = sphi %s1712_s16, %s2072_s16   ;;  %s1654_s15 = sphi %s1710_s15, %s2071_s15  }
   0xb   : > { %p44_p0 = scmp.ne.s32.totalorder %s1658_s16, %s1654_s15  ;;  %p2049_p1 = scmp.eq.s32.totalorder %s1731_s19, 0 }
   0xc   : > { %p142_p3 = scmp.eq.s32.totalorder %s1239_s20, 1  ;;  %p1240_p5 = scmp.ge.s32.totalorder %s1666_s18, 1 }
   0xd   : > { %p1740_p4 = por %p2049_p1, %p44_p0  ;;  %p149_p7 = scmp.lt.s32.totalorder %s1666_s18, 3 }
   0xe   : > { %p1745_p6 = por %p142_p3, %p44_p0  ;;  %s1668_s24 = smov [#allocation7]  }
   0xf   : > { %s2054_s21 = scalar_select %p1740_p4, 1, 0 }
  0x10   : > { %s2055_s22 = scalar_select %p1745_p6, 1, 0 }
  0x11   : > { %p1750_p8 = pnand %p1240_p5, %p149_p7  ;;  %s161_s25 = sshll.u32 %s1668_s24, 4  ;;  %s1754_s25 = int_to_ptr.vmem [resolvable:$true] %s161_s25 }
  0x12   : > { %s1669_s27 = smov [#allocation8]   ;;  %s2058_s2 = sld [smem:[#allocation16_spill]] }
  0x13   : > { %s2056_s23 = scalar_select %p1750_p8, 1, 0 }
  0x14   : > { %p1386_p9 = pneg %p1750_p8  ;;  %s174_s28 = sshll.u32 %s1669_s27, 4  ;;  %s1765_s28 = int_to_ptr.vmem [resolvable:$true] %s174_s28 }
  0x16   : > { %p1761_p11 = pnand %p1386_p9, %p2049_p1 }
  0x18   : > { %s1472_s5 = scalar_lea.hbm %s2058_s2, 512  ;;  %p1474_p13 = pneg %p1761_p11 }
  0x19   : > { %p1473_p12 = scmp.ne.s32.totalorder %s2058_s2, %s1472_s5  ;;  %p1479_p5 = scmp.lt.u32.totalorder %s1472_s5, %s2058_s2 }
  0x1b   : > { %p1475_p0 = pnand %p1474_p13, %p1473_p12 }
  0x1d   : > { %p1476_p3 = pneg %p1475_p0 }
  0x1f   : > { %p1481_p7 = pnand %p1479_p5, %p1476_p3 }
  0x21   : > { %1484 = shalt.err (!%p1481_p7)
}
  0x22   : > { %s1485_s10 = scalar_lea.vmem %s1754_s25, 512  ;;  %p1493_p2 = scmp.lt.s32.totalorder %s1754_s25, %s1754_s25 }
  0x23   : > { %p1486_p9 = scmp.ne.s32.totalorder %s1754_s25, %s1485_s10  ;;  %p1494_p12 = scmp.lt.s32.totalorder %s1485_s10, %s1485_s10 }
  0x25   : > { %p1488_p10 = pnand %p1486_p9, %p1474_p13  ;;  %p1495_p0 = por %p1494_p12, %p1493_p2 }
  0x27   : > { %p1489_p1 = pneg %p1488_p10 }
  0x29   : > { %p1496_p6 = pnand %p1495_p0, %p1489_p1 }
  0x2b   : > { %1499 = shalt.err (!%p1496_p6)
}
  0x2c   : > { %s1670_s11 = smov 128   ;;  %s1671_s12 = smov 8  }
  0x2d   : > { %1389 = dma.hbm_to_vmem [thread:$0]  (!%p1761_p11), %s2058_s2, 512, %s1754_s25, [#allocation6], %s1670_s11, %s1670_s11, %s1671_s12  }
  0x2e   : > { %s1500_s27 = scalar_lea.hbm %s2047_s3, 512 }
  0x2f   : > { %p1501_p2 = scmp.ne.s32.totalorder %s2047_s3, %s1500_s27  ;;  %p1507_p10 = scmp.lt.u32.totalorder %s1500_s27, %s2047_s3 }
  0x31   : > { %p1503_p1 = pnand %p1501_p2, %p1474_p13 }
  0x33   : > { %p1504_p6 = pneg %p1503_p1 }
  0x35   : > { %p1509_p3 = pnand %p1507_p10, %p1504_p6 }
  0x37   : > { %1512 = shalt.err (!%p1509_p3)
}
  0x38   : > { %s1513_s25 = scalar_lea.vmem %s1765_s28, 512  ;;  %p1521_p12 = scmp.lt.s32.totalorder %s1765_s28, %s1765_s28 }
  0x39   : > { %p1514_p5 = scmp.ne.s32.totalorder %s1765_s28, %s1513_s25  ;;  %p1522_p0 = scmp.lt.s32.totalorder %s1513_s25, %s1513_s25 }
  0x3b   : > { %p1516_p7 = pnand %p1514_p5, %p1474_p13  ;;  %p1523_p2 = por %p1522_p0, %p1521_p12 }
  0x3d   : > { %p1517_p9 = pneg %p1516_p7 }
  0x3f   : > { %p1524_p1 = pnand %p1523_p2, %p1517_p9 }
  0x41   : > { %1527 = shalt.err (!%p1524_p1)
}
  0x42   : > { %1392 = dma.hbm_to_vmem [thread:$0]  (!%p1761_p11), %s2047_s3, 512, %s1765_s28, [#allocation9], %s1670_s11, %s1670_s11, %s1671_s12  }
  0x43   : > { %s1820_s9 = sadd.s32 1, %s1666_s18   ;;  %s31_s26 = sadd.s32 1, %s1662_s17 }
  0x44   : > { %s28_s10 = ssub.s32 %s1666_s18, %s1820_s9  ;;  %p38_p13 = scmp.ne.s32.totalorder %s1662_s17, %s1658_s16 }
  0x45   : > { %p29_p6 = scmp.eq.s32.totalorder %s28_s10, 0  ;;  %p39_p10 = scmp.eq.s32.totalorder %s1666_s18, 0 }
  0x46   : > { %p2059_p3 = scmp.eq.s32.totalorder %s1731_s19, 1  ;;  %p1406_p7 = scmp.lt.s32.totalorder %s1666_s18, 2 }
  0x47   : > { %s1836_s14 = scalar_select %p29_p6, %s1662_s17, %s31_s26  }
  0x48   : > { %p1830_p5 = por %p2059_p3, %p38_p13  ;;  %p40_p9 = por %p39_p10, %p38_p13 }
  0x49   : > { %s188_s20 = sand.u32 1, %s1662_s17   ;;  %s1245_s11 = sshll.u32 %s1666_s18, 7 }
  0x4a   : > { %s2060_s13 = scalar_select %p1830_p5, 1, 0 }
  0x4b   : > { %s1839_s28 = sshll.u32 %s188_s20, 3  ;;  %s1845_s27 = scalar_lea.hbm %s2044_s0, %s1245_s11 }
  0x4c   : > { %s192_s29 = scalar_lea.vmem [#allocation2], %s1839_s28  ;;  %p1850_p11 = pnand %p1406_p7, %p40_p9 }
  0x4d   : > { %s199_s30 = sshll.u32 %s192_s29, 4  ;;  %s1857_s7 = scalar_lea.hbm %s2045_s1, %s1245_s11  ;;  %s1848_s30 = int_to_ptr.vmem [resolvable:$true] %s199_s30 }
  0x4e   : > { %s206_s8 = sand.u32 1, %s1666_s18   ;;  %s189_s26 = scalar_lea.sflag [#allocation3], %s188_s20 }
  0x4f   : > { %s1528_s10 = scalar_lea.hbm %s1845_s27, 128  ;;  %p1530_p0 = pneg %p1850_p11 }
  0x50   : > { %p1529_p12 = scmp.ne.s32.totalorder %s1845_s27, %s1528_s10  ;;  %s1533_s29 = scalar_lea.hbm %s2044_s0, 256 }
  0x51   : > { %p1534_p13 = scmp.lt.u32.totalorder %s1845_s27, %s2044_s0  ;;  %p1535_p6 = scmp.lt.u32.totalorder %s1533_s29, %s1528_s10 }
  0x52   : > { %p1531_p2 = pnand %p1530_p0, %p1529_p12  ;;  %p1537_p3 = scmp.lt.u32.totalorder %s1528_s10, %s1845_s27 }
  0x53   : > { %p1536_p10 = por %p1535_p6, %p1534_p13 }
  0x54   : > { %p1532_p1 = pneg %p1531_p2 }
  0x55   : > { %p1538_p7 = por %p1537_p3, %p1536_p10 }
  0x57   : > { %p1539_p9 = pnand %p1538_p7, %p1532_p1 }
  0x59   : > { %1542 = shalt.err (!%p1539_p9)
}
  0x5a   : > { %s1543_s20 = scalar_lea.vmem %s1848_s30, 128  ;;  %s1672_s11 = smov [#allocation2]  }
  0x5b   : > { %p1544_p12 = scmp.ne.s32.totalorder %s1848_s30, %s1543_s20  ;;  %s1548_s25 = sshll.u32 %s1672_s11, 4  ;;  %s1549_s25 = int_to_ptr.vmem [resolvable:$false] %s1548_s25 }
  0x5c   : > { %s1550_s2 = scalar_lea.vmem %s1549_s25, 256  ;;  %p1551_p4 = scmp.lt.s32.totalorder %s1848_s30, %s1549_s25 }
  0x5d   : > { %p1546_p2 = pnand %p1544_p12, %p1530_p0  ;;  %p1552_p13 = scmp.lt.s32.totalorder %s1550_s2, %s1543_s20 }
  0x5f   : > { %p1547_p5 = pneg %p1546_p2  ;;  %p1553_p6 = por %p1552_p13, %p1551_p4 }
  0x61   : > { %p1554_p10 = pnand %p1553_p6, %p1547_p5 }
  0x63   : > { %1557 = shalt.err (!%p1554_p10)
}
  0x64   : > { %1396 = dma.hbm_to_vmem [thread:$0]  (!%p1850_p11), %s1845_s27, 128, %s1848_s30, %s189_s26  }
  0x65   : > { %s210_s10 = scalar_lea.vmem [#allocation5], %s1839_s28  ;;  %s207_s24 = scalar_lea.sflag [#allocation6], %s206_s8 }
  0x66   : > { %s217_s12 = sshll.u32 %s210_s10, 4  ;;  %s1558_s29 = scalar_lea.hbm %s1857_s7, 128  ;;  %s218_s12 = int_to_ptr.vmem [resolvable:$true] %s217_s12 }
  0x67   : > { %p1559_p4 = scmp.ne.s32.totalorder %s1857_s7, %s1558_s29  ;;  %s1563_s11 = scalar_lea.hbm %s2045_s1, 256 }
  0x68   : > { %p1564_p3 = scmp.lt.u32.totalorder %s1857_s7, %s2045_s1  ;;  %p1565_p7 = scmp.lt.u32.totalorder %s1563_s11, %s1558_s29 }
  0x69   : > { %p1561_p5 = pnand %p1559_p4, %p1530_p0  ;;  %p1567_p12 = scmp.lt.u32.totalorder %s1558_s29, %s1857_s7 }
  0x6a   : > { %p1566_p9 = por %p1565_p7, %p1564_p3 }
  0x6b   : > { %p1562_p1 = pneg %p1561_p5 }
  0x6c   : > { %p1568_p2 = por %p1567_p12, %p1566_p9 }
  0x6e   : > { %p1569_p13 = pnand %p1568_p2, %p1562_p1 }
  0x70   : > { %1572 = shalt.err (!%p1569_p13)
}
  0x71   : > { %s1573_s28 = scalar_lea.vmem %s218_s12, 128  ;;  %s1673_s27 = smov [#allocation5]  }
  0x72   : > { %p1574_p6 = scmp.ne.s32.totalorder %s218_s12, %s1573_s28  ;;  %s1578_s30 = sshll.u32 %s1673_s27, 4  ;;  %s1579_s30 = int_to_ptr.vmem [resolvable:$false] %s1578_s30 }
  0x73   : > { %s1580_s8 = scalar_lea.vmem %s1579_s30, 256  ;;  %p1581_p5 = scmp.lt.s32.totalorder %s218_s12, %s1579_s30 }
  0x74   : > { %p1576_p10 = pnand %p1574_p6, %p1530_p0  ;;  %p1582_p8 = scmp.lt.s32.totalorder %s1580_s8, %s1573_s28 }
  0x76   : > { %p1577_p4 = pneg %p1576_p10  ;;  %p1583_p3 = por %p1582_p8, %p1581_p5 }
  0x78   : > { %p1584_p7 = pnand %p1583_p3, %p1577_p4 }
  0x7a   : > { %1587 = shalt.err (!%p1584_p7)
}
  0x7b   : > { %1399 = dma.hbm_to_vmem [thread:$0]  (!%p1850_p11), %s1857_s7, 128, %s218_s12, %s207_s24  }
  0x7c   : > { %p2062_p1 = scmp.ne.s32.totalorder %s2056_s23, 0 }
  0x7d   : > { %s1910_s26 = sand.u32 (!%p2062_p1), 1, %s1658_s16   ;;  %p2063_p8 = scmp.ne.s32.totalorder (!%p2062_p1), %s2054_s21, 0 }
  0x7e   : > { %226 = sbr.rel (%p2062_p1) target bundleno = 1209 (0x4b9), region = 36  ;;  %s1913_s10 = sshll.u32 (!%p2062_p1), %s1910_s26, 3 }
  0x7f   : > { %s229_s29 = scalar_lea.sflag (!%p2062_p1), [#allocation3], %s1910_s26  ;;  %s232_s6 = scalar_lea.vmem (!%p2062_p1), [#allocation2], %s1913_s10 }
  0x85   : > { %1633 = dma.done.wait (%p2063_p8), %s229_s29, 128  }
  0x86   : > { %1635 = vsyncadd (%p2063_p8), %s229_s29, 4294967168  ;;  %s237_s23 = sand.u32 1, %s1731_s19   ;;  %s241_s7 = scalar_lea.vmem [#allocation5], %s1913_s10 }
  0x87   : > { %s238_s5 = scalar_lea.sflag [#allocation6], %s237_s23 }
  0x88   : > { %1637 = dma.done.wait (%p2063_p8), %s238_s5, 128  }
  0x89   : > { %1639 = vsyncadd (%p2063_p8), %s238_s5, 4294967168  ;;  %p2064_p11 = scmp.eq.s32.totalorder %s1731_s19, 0 }
  0x8b   : > { %1641 = dma.done.wait (%p2064_p11), [#allocation6], 512   ;;  %p2065_p0 = pmov %p2064_p11 }
  0x8d   : > { %1643 = vsyncadd (%p2065_p0), [#allocation6], 4294966784  ;;  %p2066_p9 = pmov %p2065_p0 }
  0x8e   : > { %p2067_p12 = pmov %p2065_p0 }
  0x8f   : > { %1645 = dma.done.wait (%p2066_p9), [#allocation9], 512  }
  0x90   : > { %1647 = vsyncadd (%p2067_p12), [#allocation9], 4294966784  ;;  %v1674_v0 = vmov 0.0|0.0   ;;  %vm1675_vm0 = vmmov 0   ;;  %v1676_v1 = vmov 0.0   ;;  %v359_v2 = vld [vmem:[#allocation8] sm:$0xff] }
  0x91   : > { %1366 = vmatprep.subr.bf16.mxu1 %v1674_v0  ;;  %1360 = vmatprep.subr.bf16.mxu0 %v1674_v0  ;;  %v360_v3 = vld [vmem:[#allocation8 + $0x8] sm:$0xff]  ;;  %v280_v4 = vld [vmem:[#allocation7] sm:$0xff]  ;;  %v361_v7 = vld [vmem:[#allocation8 + $0x10] sm:$0xff]  ;;  %vm284_vm1 = vcmask 261120   ;;  %vm450_vm2 = vcmask 64512   ;;  %s1677_s21 = smov 112  }
  0x92   : > { %1317 = vmatprep.mubr.msk.f32.mxu1 %vm1675_vm0, %v1676_v1  ;;  %1306 = vmatprep.mubr.msk.f32.mxu0 %vm1675_vm0, %v1676_v1  ;;  %v1367_v5 = vpack.c.bf16 %v360_v3, %v359_v2  ;;  %v281_v6 = vld [vmem:[#allocation7 + $0x8] sm:$0xff]  ;;  %v362_v8 = vld [vmem:[#allocation8 + $0x18] sm:$0xff]  ;;  %v282_v10 = vld [vmem:[#allocation7 + $0x10] sm:$0xff]  ;;  %s1678_s12 = smov 120   ;;  %s1679_s24 = smov 104   ;;  %vm1108_vm3 = vcmask 130048  }
  0x93   : > { %v1361_v9 = vpack.c.bf16 %v281_v6, %v280_v4  ;;  %v283_v11 = vld [vmem:[#allocation7 + $0x18] sm:$0xff]  ;;  %v1370_v12 = vpack.c.bf16 %v362_v8, %v361_v7  ;;  %v279_v15 = vld [vmem:[%s232_s6] sm:$0xff]  ;;  %s1680_s20 = smov 96   ;;  %s1681_s11 = smov 8   ;;  %vm1110_vm4 = vcmask 195584  }
  0x94   : > { %1368 = vmatpush3.bf16.msra.mxu1 %v1367_v5  ;;  %v1364_v13 = vpack.c.bf16 %v283_v11, %v282_v10  ;;  %v358_v14 = vld [vmem:[%s241_s7] sm:$0xff]  ;;  %s1682_s25 = smov 16   ;;  %s1683_s2 = smov 24  }
  0x95   : > { %1362 = vmatpush3.bf16.msra.mxu0 %v1361_v9  ;;  %1369 = vmatprep.subr.bf16.mxu1 %v1674_v0  ;;  %s1269_s28 = sshll.u32 %s1731_s19, 7  ;;  %s278_s27 = scalar_lea.vmem [#allocation10], %s1913_s10 }
  0x96   : > { %1363 = vmatprep.subr.bf16.mxu0 %v1674_v0  ;;  %s1127_s30 = sshll.u32 %s278_s27, 4  ;;  %s1999_s6 = scalar_lea.hbm %s2048_s4, %s1269_s28  ;;  %s2001_s30 = int_to_ptr.vmem [resolvable:$true] %s1127_s30 }
  0x97   : > { %s1114_s19 = scalar_lea.sflag [#allocation4], %s1910_s26  ;;  %s1588_s10 = scalar_lea.vmem %s2001_s30, 128 }
  0x98   : > { %1371 = vmatpush3.bf16.msra.mxu1 %v1370_v12  ;;  %p1589_p2 = scmp.ne.s32.totalorder %s2001_s30, %s1588_s10  ;;  %p2068_p13 = scmp.ne.s32.totalorder %s2060_s13, 0 }
  0x99   : > { %1365 = vmatpush3.bf16.msra.mxu0 %v1364_v13  ;;  %1325 = vmatprep.subr.mxu1 %v1676_v1  ;;  %s1684_s23 = smov [#allocation10]  }
  0x9a   : > { %1320 = vmatprep.subr.mxu0 %v1676_v1  ;;  %p1590_p6 = pnand %p1589_p2, %p2068_p13  ;;  %s1592_s5 = sshll.u32 %s1684_s23, 4  ;;  %s1593_s5 = int_to_ptr.vmem [resolvable:$false] %s1592_s5 }
  0x9b   : > { %1318 = vmatmul.mubr.msk.f32.vlgmr.msra.gmra.mrb[0].mxu1 %vm284_vm1, %v358_v14  ;;  %s1594_s7 = scalar_lea.vmem %s1593_s5, 256  ;;  %p1595_p4 = scmp.lt.s32.totalorder %s2001_s30, %s1593_s5 }
  0x9c   : > { %1307 = vmatmul.mubr.msk.f32.vlgmr.msra.gmra.mrb[0].mxu0 %vm284_vm1, %v279_v15  ;;  %1327 = vmatprep.mubr.msk.f32.mxu1 %vm1675_vm0, %v1676_v1  ;;  %p1591_p10 = pneg %p1590_p6  ;;  %p1596_p5 = scmp.lt.s32.totalorder %s1594_s7, %s1588_s10 }
  0x9d   : > { %1322 = vmatprep.mubr.msk.f32.mxu0 %vm1675_vm0, %v1676_v1 }
  0x9e   : > { %p1597_p3 = por %p1596_p5, %p1595_p4 }
  0xa0   : > { %p1598_p7 = pnand %p1597_p3, %p1591_p10 }
 0x16e   : > { %v432_v16 = vpop.f32.mrb[0].mxu1 }
 0x16f   : > { %446 = vrot.lane.b32.xlu1 %v432_v16, %s1677_s21  ;;  %444 = vrot.lane.b32.xlu0 %v432_v16, %s1678_s12  ;;  %v1319_v17 = vpop.f32.mrb[1].mxu1  ;;  %v354_v18 = vpop.f32.mrb[0].mxu0 }
 0x170   : > { %1321 = vmatpush3.xpose.msk.msra.mxu0 %vm450_vm2, %v432_v16  ;;  %v1308_v19 = vpop.f32.mrb[1].mxu0 }
 0x171   : > { %1330 = vmatprep.subr.mxu0 %v1676_v1 }
 0x173   : > { %1323 = vmatmul.mubr.msk.f32.vlgmr.msra.gmra.mrb[2].mxu0 %vm450_vm2, %v354_v18  ;;  %448 = vrot.lane.b32.xlu1 %v432_v16, %s1679_s24 }
 0x174   : > { %437 = vrot.lane.b32.xlu0 %v354_v18, %s1678_s12  ;;  %1332 = vmatprep.mubr.msk.f32.mxu0 %vm1675_vm0, %v1676_v1 }
 0x177   : > { %441 = vrot.lane.b32.xlu1 %v354_v18, %s1679_s24 }
 0x178   : > { %439 = vrot.lane.b32.xlu0 %v354_v18, %s1677_s21 }
 0x17b   : > { %783 = vrot.lane.b32.xlu1 %v432_v16, %s1680_s20 }
 0x1e1   : > { %v447_v20 = vpop.permute.xlu1 %446  ;;  %v445_v21 = vpop.permute.xlu0 %444 }
 0x1e2   : > { %1326 = vmatpush3.xpose.msk.msra.mxu1 %vm450_vm2, %v445_v21  ;;  %1331 = vmatpush3.xpose.msk.msra.mxu0 %vm450_vm2, %v447_v20 }
 0x1e3   : > { %1335 = vmatprep.subr.mxu1 %v1676_v1  ;;  %1340 = vmatprep.subr.mxu0 %v1676_v1 }
 0x1e5   : > { %v449_v22 = vpop.permute.xlu1 %448 }
 0x1e6   : > { %v438_v23 = vpop.permute.xlu0 %437 }
 0x1e7   : > { %1328 = vmatmul.mubr.msk.f32.vlgmr.msra.gmra.mrb[2].mxu1 %vm450_vm2, %v438_v23 }
 0x1e8   : > { %1336 = vmatpush3.xpose.msk.msra.mxu1 %vm450_vm2, %v449_v22  ;;  %1337 = vmatprep.mubr.msk.f32.mxu1 %vm1675_vm0, %v1676_v1 }
 0x1e9   : > { %v442_v24 = vpop.permute.xlu1 %441  ;;  %1345 = vmatprep.subr.mxu1 %v1676_v1 }
 0x1ea   : > { %v440_v25 = vpop.permute.xlu0 %439 }
 0x1eb   : > { %1333 = vmatmul.mubr.msk.f32.vlgmr.msra.gmra.mrb[4].mxu0 %vm450_vm2, %v440_v25  ;;  %1338 = vmatmul.mubr.msk.f32.vlgmr.msra.gmra.mrb[4].mxu1 %vm450_vm2, %v442_v24 }
 0x1ec   : > { %1342 = vmatprep.mubr.msk.f32.mxu0 %vm1675_vm0, %v1676_v1  ;;  %1347 = vmatprep.mubr.msk.f32.mxu1 %vm1675_vm0, %v1676_v1 }
 0x1ed   : > { %v784_v26 = vpop.permute.xlu1 %783 }
 0x1ee   : > { %1341 = vmatpush3.msra.mxu0 %v784_v26 }
 0x1ef   : > { %1350 = vmatprep.subr.mxu0 %v1676_v1 }
 0x246   : > { %v521_v27 = vpop.f32.mrb[2].mxu0 }
 0x247   : > { %v1324_v28 = vpop.f32.mrb[3].mxu0  ;;  %v747_v29 = vsel %vm450_vm2, %v521_v27, -inf }
 0x248   : > { %748 = vmax.xlane.f32.xlu0 %v747_v29 }
 0x2ba   : > { %v595_v30 = vpop.f32.mrb[2].mxu1 }
 0x2bb   : > { %v1329_v31 = vpop.f32.mrb[3].mxu1  ;;  %v750_v32 = vsel %vm450_vm2, %v595_v30, -inf }
 0x2bc   : > { %751 = vmax.xlane.f32.xlu1 %v750_v32 }
 0x2be   : > { %v669_v33 = vpop.f32.mrb[4].mxu0  ;;  %v743_v34 = vpop.f32.mrb[4].mxu1 }
 0x2bf   : > { %v1334_v35 = vpop.f32.mrb[5].mxu0  ;;  %v1339_v36 = vpop.f32.mrb[5].mxu1  ;;  %v753_v37 = vsel %vm450_vm2, %v669_v33, -inf  ;;  %v756_v38 = vsel %vm450_vm2, %v743_v34, -inf }
 0x2c0   : > { %754 = vmax.xlane.f32.xlu0 %v753_v37 }
 0x2c4   : > { %757 = vmax.xlane.f32.xlu0 %v756_v38 }
 0x2cd   : > { %935 = vrot.lane.b32.xlu1 %v447_v20, %s1680_s20 }
 0x2d1   : > { %1011 = vrot.lane.b32.xlu1 %v449_v22, %s1680_s20 }
 0x2d5   : > { %v749_v39 = vpop.xlane.xlu0 %748 }
 0x2d6   : > { %v759_v40 = vsub.f32 %v521_v27, %v749_v39 }
 0x2d8   : > { %v763_v41 = vmul.f32 1.442695, %v759_v40 }
 0x2da   : > { %1456 = vpow2.f32 %v763_v41  ;;  %859 = vrot.lane.b32.xlu0 %v445_v21, %s1680_s20 }
 0x2e4   : > { %v1457_v42 = vpop.eup %1456 }
 0x2e5   : > { %1343 = vmatmul.mubr.msk.f32.vlgmr.msra.gmra.mrb[6].mxu0 %vm450_vm2, %v1457_v42  ;;  %v771_v61 = vsel %vm450_vm2, %v1457_v42, 0.0 }
 0x2e6   : > { %1352 = vmatprep.mubr.msk.f32.mxu0 %vm1675_vm0, %v1676_v1 }
 0x349   : > { %v752_v43 = vpop.xlane.xlu1 %751 }
 0x34a   : > { %v760_v44 = vsub.f32 %v595_v30, %v752_v43 }
 0x34c   : > { %v765_v45 = vmul.f32 1.442695, %v760_v44 }
 0x34d   : > { %v936_v46 = vpop.permute.xlu1 %935  ;;  %v755_v47 = vpop.xlane.xlu0 %754 }
 0x34e   : > { %1458 = vpow2.f32 %v765_v45  ;;  %v761_v48 = vsub.f32 %v669_v33, %v755_v47  ;;  %1351 = vmatpush3.msra.mxu0 %v936_v46 }
 0x350   : > { %v767_v49 = vmul.f32 1.442695, %v761_v48 }
 0x351   : > { %v758_v50 = vpop.xlane.xlu0 %757  ;;  %v1012_v55 = vpop.permute.xlu1 %1011 }
 0x352   : > { %1460 = vpow2.f32 %v767_v49  ;;  %v762_v51 = vsub.f32 %v743_v34, %v758_v50 }
 0x354   : > { %v769_v52 = vmul.f32 1.442695, %v762_v51 }
 0x355   : > { %v860_v53 = vpop.permute.xlu0 %859 }
 0x356   : > { %1462 = vpow2.f32 %v769_v52  ;;  %1346 = vmatpush3.msra.mxu1 %v860_v53 }
 0x357   : > { %1355 = vmatprep.subr.mxu1 %v1676_v1 }
 0x358   : > { %v1459_v54 = vpop.eup %1458 }
 0x359   : > { %1348 = vmatmul.mubr.msk.f32.vlgmr.msra.gmra.mrb[6].mxu1 %vm450_vm2, %v1459_v54  ;;  %v774_v56 = vsel %vm450_vm2, %v1459_v54, 0.0 }
 0x35a   : > { %1356 = vmatpush3.msra.mxu1 %v1012_v55  ;;  %775 = vadd.xlane.f32.xlu0 %v774_v56 }
 0x35b   : > { %1357 = vmatprep.mubr.msk.f32.mxu1 %vm1675_vm0, %v1676_v1 }
 0x35c   : > { %v1461_v57 = vpop.eup %1460 }
 0x35d   : > { %1353 = vmatmul.mubr.msk.f32.vlgmr.msra.gmra.mrb[8].mxu0 %vm450_vm2, %v1461_v57  ;;  %v777_v58 = vsel %vm450_vm2, %v1461_v57, 0.0 }
 0x35e   : > { %778 = vadd.xlane.f32.xlu1 %v777_v58 }
 0x360   : > { %v1463_v59 = vpop.eup %1462 }
 0x361   : > { %1358 = vmatmul.mubr.msk.f32.vlgmr.msra.gmra.mrb[8].mxu1 %vm450_vm2, %v1463_v59  ;;  %v780_v60 = vsel %vm450_vm2, %v1463_v59, 0.0 }
 0x362   : > { %781 = vadd.xlane.f32.xlu0 %v780_v60 }
 0x366   : > { %772 = vadd.xlane.f32.xlu0 %v771_v61 }
 0x3b8   : > { %v855_v62 = vpop.f32.mrb[6].mxu0 }
 0x3b9   : > { %v1344_v63 = vpop.f32.mrb[7].mxu0 }
 0x3e7   : > { %v776_v0 = vpop.xlane.xlu0 %775 }
 0x3e8   : > { %1464 = vrcp.f32 %v776_v0 }
 0x3eb   : > { %v779_v1 = vpop.xlane.xlu1 %778 }
 0x3ec   : > { %1466 = vrcp.f32 %v779_v1 }
 0x3ef   : > { %v782_v2 = vpop.xlane.xlu0 %781 }
 0x3f0   : > { %1468 = vrcp.f32 %v782_v2 }
 0x3f2   : > { %v1465_v3 = vpop.eup %1464 }
 0x3f3   : > { %v773_v15 = vpop.xlane.xlu0 %772 }
 0x3f4   : > { %1470 = vrcp.f32 %v773_v15 }
 0x3f6   : > { %v1467_v7 = vpop.eup %1466 }
 0x3fa   : > { %v1469_v11 = vpop.eup %1468 }
 0x3fe   : > { %v1471_v16 = vpop.eup %1470 }
 0x3ff   : > { %v1091_v18 = vmul.f32 %v1471_v16, %v855_v62 }
 0x42c   : > { %v931_v4 = vpop.f32.mrb[6].mxu1 }
 0x42d   : > { %v1092_v5 = vmul.f32 %v1465_v3, %v931_v4  ;;  %v1349_v6 = vpop.f32.mrb[7].mxu1 }
 0x42f   : > { %1096 = vrot.lane.b32.xlu1 %v1092_v5, %s1681_s11 }
 0x430   : > { %v1007_v8 = vpop.f32.mrb[8].mxu0 }
 0x431   : > { %v1093_v9 = vmul.f32 %v1467_v7, %v1007_v8  ;;  %v1354_v10 = vpop.f32.mrb[9].mxu0 }
 0x433   : > { %1100 = vrot.lane.b32.xlu0 %v1093_v9, %s1682_s25 }
 0x434   : > { %v1083_v12 = vpop.f32.mrb[8].mxu1 }
 0x435   : > { %v1094_v13 = vmul.f32 %v1469_v11, %v1083_v12  ;;  %v1359_v14 = vpop.f32.mrb[9].mxu1 }
 0x437   : > { %1104 = vrot.lane.b32.xlu1 %v1094_v13, %s1683_s2 }
 0x4a1   : > { %v1097_v17 = vpop.permute.xlu1 %1096 }
 0x4a2   : > { %v1107_v20 = vsel %vm450_vm2, %v1091_v18, %v1097_v17 }
 0x4a5   : > { %v1101_v19 = vpop.permute.xlu0 %1100 }
 0x4a6   : > { %v1109_v21 = vsel %vm1108_vm3, %v1107_v20, %v1101_v19 }
 0x4a9   : > { %v1105_v22 = vpop.permute.xlu1 %1104 }
 0x4aa   : > { %v1111_v23 = vsel %vm1110_vm4, %v1109_v21, %v1105_v22 }
 0x4ab   : > { %1112 = vst.msk [vmem:[%s278_s27] sm:$0xff] %vm284_vm1, %v1111_v23 }
 0x4ac   : > { %1601 = shalt.err (!%p1598_p7)
}
 0x4ad   : > { %s1602_s26 = scalar_lea.hbm %s1999_s6, 128  ;;  %s1606_s24 = scalar_lea.hbm %s2048_s4, 256 }
 0x4ae   : > { %p1603_p1 = scmp.ne.s32.totalorder %s1999_s6, %s1602_s26  ;;  %p1607_p0 = scmp.lt.u32.totalorder %s1999_s6, %s2048_s4 }
 0x4af   : > { %p1608_p9 = scmp.lt.u32.totalorder %s1606_s24, %s1602_s26  ;;  %p1610_p2 = scmp.lt.u32.totalorder %s1602_s26, %s1999_s6 }
 0x4b0   : > { %p1604_p8 = pnand %p1603_p1, %p2068_p13 }
 0x4b1   : > { %p1609_p12 = por %p1608_p9, %p1607_p0 }
 0x4b2   : > { %p1605_p11 = pneg %p1604_p8 }
 0x4b3   : > { %p1611_p6 = por %p1610_p2, %p1609_p12 }
 0x4b5   : > { %p1612_p10 = pnand %p1611_p6, %p1605_p11 }
 0x4b7   : > { %1615 = shalt.err (!%p1612_p10)
}
 0x4b8   : > { %1384 = dma.vmem_to_hbm [thread:$0]  (%p2068_p13), %s2001_s30, 128, %s1999_s6, %s1114_s19  }
 0x4b9 PF: > { %s1139_s25 = sand.u32 1, %s1654_s15   ;;  %p2069_p4 = scmp.ne.s32.totalorder %s2055_s22, 0 }
 0x4ba   : > { %p2070_p5 = scmp.ge.s32.totalorder %s1666_s18, 2  ;;  %s1140_s2 = scalar_lea.sflag [#allocation4], %s1139_s25 }
 0x4bc   : > { %p1401_p3 = pnand %p2070_p5, %p2069_p4 }
 0x4be   : > { %1649 = dma.done.wait (!%p1401_p3), %s1140_s2, 128  }
 0x4bf   : > { %1651 = vsyncadd (!%p1401_p3), %s1140_s2, 4294967168  ;;  %p21_p7 = scmp.ge.s32.totalorder %s1820_s9, 4   ;;  %s2071_s15 = smov %s1658_s16 }
 0x4c0   : > { %s2072_s16 = smov %s1662_s17  ;;  %s2073_s17 = smov %s1836_s14 }
 0x4c1   : > { %s2074_s18 = smov %s1820_s9  ;;  %23 = sbr.rel (!%p21_p7) target bundleno = 10 (0xa), region = 102 }
 0x4c8   :  { %1145 = vsyncpa [#allocation3], 1 }
 0x4c9   :  { %1147 = vsyncpa [#allocation3 + $0x1], 1 }
 0x4ca   :  { %1148 = vsyncpa [#allocation6], 1 }
 0x4cb   :  { %1150 = vsyncpa [#allocation6 + $0x1], 1 }
 0x4cc   :  { %1151 = vsyncpa [#allocation9], 1 }
 0x4cd   :  { %1152 = vsyncpa [#allocation4], 1 }
 0x4ce   :  { %1154 = vsyncpa [#allocation4 + $0x1], 1 }

</bundles_post_ra>
